<compile_context>
chip_gen: v7x
topology: tpu7x:2x2x1
jax: 0.10.0
libtpu: 0.0.40
codegen_flags: <defaults>
</compile_context>

<pallas_src>
import functools

import jax
import jax.numpy as jnp
from jax.experimental import pallas as pl
from jax.experimental.pallas import tpu as pltpu


LANE = 128                 # lane width: last dims padded to a multiple of this
TILE_M_CAP = 512           # node-row tile cap (amortizes ~0.35us per-step cost)
MXU_DTYPE = jnp.bfloat16   # MXU fast path on v5e/v6e/v7x: bf16 in, f32 accumulate


def _round_up(x, m):
    return ((x + m - 1) // m) * m


def _pad2(a, rows, cols):
    return jnp.pad(a, ((0, rows - a.shape[0]), (0, cols - a.shape[1])))


def _pad_vec(v, cols):
    out = jnp.zeros((1, cols), jnp.float32)
    return out.at[0, : v.shape[0]].set(v.astype(jnp.float32))


def _choose_row_tile(num_nodes):
    """Row tile (multiple of 8, <= TILE_M_CAP) and padded node count."""
    m8 = _round_up(num_nodes, 8)
    tile = min(TILE_M_CAP, m8)
    m_pad = _round_up(m8, tile)
    return tile, m_pad


def _invariant_spec(shape, index_map):
    """BlockSpec for a grid-invariant operand: single VMEM buffer.

    The block index never changes across the grid, so the DMA happens once and
    double buffering would only waste VMEM (critical on v7x's 64 MiB)."""
    try:
        return pl.BlockSpec(shape, index_map, pipeline_mode=pl.Buffered(1))
    except TypeError:  # older jax without pipeline_mode kwarg: default buffering
        return pl.BlockSpec(shape, index_map)


def _layer_vmem_bytes(tile_m, m_pad, pd):
    bf, f4 = 2, 4
    a_bufs = 2 * tile_m * m_pad * bf     # A dst-row tile (double-buffered, bf16)
    x_full = m_pad * pd * bf             # resident X (single-buffered, bf16)
    weights = 2 * pd * pd * bf           # W1', W2' (single-buffered, bf16)
    biases = 2 * pd * f4                 # b1', b2' (f32)
    out_bufs = 2 * tile_m * pd * bf      # output tile (double-buffered, bf16)
    return a_bufs + x_full + weights + biases + out_bufs


# --------------------------- fused GIN layer kernel --------------------------

def _gin_conv_kernel(a_ref, xfull_ref, w1_ref, b1_ref, w2_ref, b2_ref, o_ref):
    # GIN aggregation for this dst-row tile: (A + (1+eps) I)_tile @ X_full.
    agg = jnp.dot(a_ref[...], xfull_ref[...], preferred_element_type=jnp.float32)
    # MLP linear 1 (BN1 folded into W1'/b1') + ReLU.
    h1 = jnp.maximum(
        jnp.dot(agg.astype(MXU_DTYPE), w1_ref[...],
                preferred_element_type=jnp.float32) + b1_ref[...], 0.0)
    # MLP linear 2 (post-conv BN folded into W2'/b2') + ReLU.
    h2 = jnp.maximum(
        jnp.dot(h1.astype(MXU_DTYPE), w2_ref[...],
                preferred_element_type=jnp.float32) + b2_ref[...], 0.0)
    o_ref[...] = h2.astype(o_ref.dtype)


def gin_conv_layer(adj, x, layer, *, tile_m):
    m_pad, pd = x.shape
    grid = (m_pad // tile_m,)
    ws = _layer_vmem_bytes(tile_m, m_pad, pd)
    # Explicit VMEM budget: default scoped limit is only 16 MiB on v5e /
    # 32 MiB on v6e & v7x; size against the actual working set with headroom.
    vmem_limit = int(max(32 << 20, min(2 * ws + (4 << 20), 96 << 20)))
    return pl.pallas_call(
        _gin_conv_kernel,
        grid=grid,
        in_specs=[
            pl.BlockSpec((tile_m, m_pad), lambda i: (i, 0)),   # A dst-row tile
            _invariant_spec((m_pad, pd), lambda i: (0, 0)),    # full X (resident)
            _invariant_spec((pd, pd), lambda i: (0, 0)),       # W1' (BN1 folded)
            _invariant_spec((1, pd), lambda i: (0, 0)),        # b1'
            _invariant_spec((pd, pd), lambda i: (0, 0)),       # W2' (post-BN folded)
            _invariant_spec((1, pd), lambda i: (0, 0)),        # b2'
        ],
        out_specs=pl.BlockSpec((tile_m, pd), lambda i: (i, 0)),
        out_shape=jax.ShapeDtypeStruct((m_pad, pd), MXU_DTYPE),
        compiler_params=pltpu.CompilerParams(
            dimension_semantics=("parallel",),
            vmem_limit_bytes=vmem_limit),
    )(adj, x, layer["w1"], layer["b1"], layer["w2"], layer["b2"])
    # TODO(synk): add a source-node (K) grid axis + f32 agg scratch so X_full
    # need not be fully VMEM-resident for very large graphs.


# --------------------------- per-layer pooling kernel -------------------------

def _pool_kernel(p_ref, x_ref, o_ref):
    # global_add_pool == P @ X (bf16 MXU, f32 accumulate).
    o_ref[...] = jnp.dot(p_ref[...], x_ref[...], preferred_element_type=jnp.float32)


def global_add_pool(pool_p, h):
    g_pad, _ = pool_p.shape
    pd = h.shape[1]
    # TODO(synk): tile over the node dimension with an f32 accumulator when the
    # pooling operands no longer fit VMEM in one block.
    return pl.pallas_call(
        _pool_kernel,
        out_shape=jax.ShapeDtypeStruct((g_pad, pd), jnp.float32),
    )(pool_p, h)


# --------------------------- fused readout kernel ----------------------------

def _readout_kernel(ph_ref, wh_ref, bh_ref, o_ref, *, num_classes):
    head = pl.program_id(0)

    @pl.when(head == 0)
    def _():
        o_ref[...] = jnp.zeros_like(o_ref)

    # Per-head fc on the (tiny) pre-pooled features; dropout(eval) = identity.
    o_ref[...] += (jnp.dot(ph_ref[0].astype(MXU_DTYPE), wh_ref[0],
                           preferred_element_type=jnp.float32) + bh_ref[0])

    @pl.when(head == pl.num_programs(0) - 1)
    def _():
        s = o_ref[...]
        lane = jax.lax.broadcasted_iota(jnp.int32, s.shape, 1)
        s = jnp.where(lane < num_classes, s, -1e30)    # mask padded class lanes
        m = jnp.max(s, axis=-1, keepdims=True)
        lse = jnp.log(jnp.sum(jnp.exp(s - m), axis=-1, keepdims=True)) + m
        o_ref[...] = s - lse                           # log_softmax


def readout(pooled_heads, fc_w, fc_b, num_classes):
    n_heads, g_pad, pd = pooled_heads.shape
    c_pad = fc_w.shape[-1]
    return pl.pallas_call(
        functools.partial(_readout_kernel, num_classes=num_classes),
        grid=(n_heads,),
        in_specs=[
            pl.BlockSpec((1, g_pad, pd), lambda h: (h, 0, 0)),   # pre-pooled feats
            pl.BlockSpec((1, pd, c_pad), lambda h: (h, 0, 0)),   # per-head fc weight
            pl.BlockSpec((1, 1, c_pad), lambda h: (h, 0, 0)),    # per-head fc bias
        ],
        out_specs=pl.BlockSpec((g_pad, c_pad), lambda h: (0, 0)),  # resident accumulator
        out_shape=jax.ShapeDtypeStruct((g_pad, c_pad), jnp.float32),
        compiler_params=pltpu.CompilerParams(dimension_semantics=("arbitrary",)),
    )(pooled_heads, fc_w, fc_b)


# --------------------------- parameters --------------------------------------

def init_params(key, num_features, num_classes, dim, num_layers=4):
    pd = max(_round_up(num_features, LANE), _round_up(dim, LANE))
    c_pad = _round_up(num_classes, LANE)
    keys = iter(jax.random.split(key, 128))

    def linear(fan_in, fan_out):
        k1, k2 = jax.random.split(next(keys))
        lim = fan_in ** -0.5
        w = jax.random.uniform(k1, (fan_in, fan_out), jnp.float32, -lim, lim)
        b = jax.random.uniform(k2, (fan_out,), jnp.float32, -lim, lim)
        return w, b

    def bn(n):
        # eval-mode BN: running_mean=0, running_var=1, affine gamma/beta
        k1, k2 = jax.random.split(next(keys))
        gamma = 1.0 + 0.1 * jax.random.normal(k1, (n,), jnp.float32)
        beta = 0.1 * jax.random.normal(k2, (n,), jnp.float32)
        rm = jnp.zeros((n,), jnp.float32)
        rv = jnp.ones((n,), jnp.float32)
        scale = gamma / jnp.sqrt(rv + 1e-5)
        shift = beta - rm * scale
        return scale, shift

    convs = []
    in_dim = num_features
    for _ in range(num_layers):
        w1, b1 = linear(in_dim, dim)
        s1, t1 = bn(dim)                 # BN inside the GIN MLP
        w2, b2 = linear(dim, dim)
        s2, t2 = bn(dim)                 # post-conv BN (fused into this layer)
        # Fold eval-mode BN into the linear layers (exact in eval mode).
        w1f, b1f = w1 * s1[None, :], b1 * s1 + t1
        w2f, b2f = w2 * s2[None, :], b2 * s2 + t2
        convs.append(dict(
            w1=_pad2(w1f, pd, pd).astype(MXU_DTYPE),
            b1=_pad_vec(b1f, pd),
            w2=_pad2(w2f, pd, pd).astype(MXU_DTYPE),
            b2=_pad_vec(b2f, pd)))
        in_dim = dim

    fc_ws, fc_bs = [], []
    w, b = linear(num_features, num_classes)
    fc_ws.append(_pad2(w, pd, c_pad)); fc_bs.append(_pad_vec(b, c_pad))
    for _ in range(num_layers):
        w, b = linear(dim, num_classes)
        fc_ws.append(_pad2(w, pd, c_pad)); fc_bs.append(_pad_vec(b, c_pad))

    return dict(convs=convs,
                fc_w=jnp.stack(fc_ws, axis=0).astype(MXU_DTYPE),  # [L+1, pd, c_pad]
                fc_b=jnp.stack(fc_bs, axis=0),                    # [L+1, 1,  c_pad]
                pd=pd, c_pad=c_pad)


# --------------------------- forward ------------------------------------------

def gnn_forward(params, x, adj, pool_mat, num_classes, eps=0.0):
    num_nodes = x.shape[0]
    num_graphs = pool_mat.shape[0]
    pd = params["pd"]

    tile_m, m_pad = _choose_row_tile(num_nodes)
    g_pad = _round_up(num_graphs, 8)

    # Lane-dense padded, bf16 compute path (padded rows/cols never leak: zero
    # adjacency/pool columns, zero weight rows/cols, masked class lanes).
    # (1+eps) self term folded into the adjacency diagonal (exact for eps=0).
    adj_self = adj + (1.0 + eps) * jnp.eye(num_nodes, dtype=jnp.float32)
    adj_p = _pad2(adj_self, m_pad, m_pad).astype(MXU_DTYPE)
    x_p = _pad2(x, m_pad, pd).astype(MXU_DTYPE)
    pool_p = _pad2(pool_mat, g_pad, m_pad).astype(MXU_DTYPE)

    # Pre-pool each head right away (tiny [g_pad, pd] results) instead of
    # stacking full node-feature tensors through HBM for the readout.
    pooled = [global_add_pool(pool_p, x_p)]
    h = x_p
    for layer in params["convs"]:
        h = gin_conv_layer(adj_p, h, layer, tile_m=tile_m)
        pooled.append(global_add_pool(pool_p, h))

    pooled_heads = jnp.stack(pooled, axis=0)       # [L+1, g_pad, pd] (tiny)
    logp = readout(pooled_heads, params["fc_w"], params["fc_b"], num_classes)
    return logp[:num_graphs, :num_classes], 0


# --------------------------- main ---------------------------------------------

if __name__ == "__main__":
    num_features, num_classes, hidden_units, dropout = 8, 4, 32, 0.5
    num_nodes, num_graphs = 16, 2
    per_graph = num_nodes // num_graphs

    key = jax.random.PRNGKey(0)
    k_x, k_p = jax.random.split(key)

    # node features
    x = jax.random.normal(k_x, (num_nodes, num_features), jnp.float32)

    # bidirectional ring within each graph
    src, dst = [], []
    for g in range(num_graphs):
        base = g * per_graph
        for i in range(per_graph):
            a, b = base + i, base + (i + 1) % per_graph
            src += [a, b]
            dst += [b, a]
    edge_index = jnp.array([src, dst], dtype=jnp.int32)          # [2, E]
    batch = jnp.array([g for g in range(num_graphs) for _ in range(per_graph)],
                      dtype=jnp.int32)                            # [num_nodes]

    # dense adjacency: A[dst, src] = 1  (GIN sums source messages at target)
    adj = jnp.zeros((num_nodes, num_nodes), jnp.float32)
    adj = adj.at[edge_index[1], edge_index[0]].add(1.0)

    # one-hot pooling matrix for global_add_pool
    pool_mat = (batch[None, :] == jnp.arange(num_graphs)[:, None]).astype(jnp.float32)

    params = init_params(k_p, num_features, num_classes, hidden_units)

    logp, aux = gnn_forward(params, x, adj, pool_mat, num_classes)
    logp = jax.block_until_ready(logp)

    assert logp.shape == (num_graphs, num_classes)
    assert bool(jnp.all(jnp.isfinite(logp)))
    # rows of log_softmax must exp-sum to 1
    assert bool(jnp.allclose(jnp.sum(jnp.exp(logp), axis=-1), 1.0, atol=1e-5))
    print("KERNEL_OK")
</pallas_src>

<mosaic_0001>
module attributes {stable_mosaic.version = 11 : i64} {
  func.func @_pool_kernel(%arg0: memref<8x16xbf16, #tpu.memory_space<vmem>>, %arg1: memref<16x128xbf16, #tpu.memory_space<vmem>>, %arg2: memref<8x128xf32, #tpu.memory_space<vmem>>) attributes {dimension_semantics = [], scalar_prefetch = 0 : i64, scratch_operands = 0 : i64, tpu.core_type = #tpu.core_type<tc>} {
    %c0 = arith.constant 0 : index
    %c0_0 = arith.constant 0 : index
    %0 = vector.load %arg0[%c0, %c0_0] : memref<8x16xbf16, #tpu.memory_space<vmem>>, vector<8x16xbf16>
    %c0_1 = arith.constant 0 : index
    %c0_2 = arith.constant 0 : index
    %1 = vector.load %arg1[%c0_1, %c0_2] : memref<16x128xbf16, #tpu.memory_space<vmem>>, vector<16x128xbf16>
    %cst = arith.constant dense<0.000000e+00> : vector<8x128xf32>
    %2 = tpu.matmul %0, %1, %cst {dimension_numbers = #tpu.dot_dimension_numbers<[1], [0], [0], [1], [0, 0, 1, 1], [], []>} : vector<8x16xbf16>, vector<16x128xbf16>, vector<8x128xf32> -> vector<8x128xf32>
    %c0_3 = arith.constant 0 : index
    %c0_4 = arith.constant 0 : index
    %3 = vector.load %arg2[%c0_3, %c0_4] : memref<8x128xf32, #tpu.memory_space<vmem>>, vector<8x128xf32>
    tpu.vector_store %arg2[%c0_3, %c0_4], %2 {strides = array<i32>} : memref<8x128xf32, #tpu.memory_space<vmem>>, vector<8x128xf32>,
    return
  }
}

</mosaic_0001>

<bundles_post_ra>
// kernel: tpu_custom_call.1
= control target key start
LH: loop header
LB: loop body
LE: loop exit
PB: predicated region body
PF: predicated region fallthrough
CT: control target
= control target key end

     0   :  { %7 = vsyncpa [#allocation3], 0  ;;  %s264_s0 = inlined_call_operand.hbm [shape: bf16[8,16], index: 0, kind: input, shape index: {}]   ;;  %s265_s1 = inlined_call_operand.hbm [shape: bf16[16,128], index: 1, kind: input, shape index: {}]   ;;  %s266_s2 = inlined_call_operand.hbm [shape: f32[8,128], index: 2, kind: output, shape index: {}]  }
   0x1   :  { %8 = vsyncpa [#allocation6], 0 }
   0x2   :  { %9 = vsyncpa [#allocation4], 0  ;;  %s199_s9 = smov [#allocation2]   ;;  %s200_s11 = smov [#allocation5]  }
   0x3   :  { %s16_s10 = sshll.u32 %s199_s9, 4  ;;  %s25_s12 = sshll.u32 %s200_s11, 4  ;;  %s17_s10 = int_to_ptr.vmem [resolvable:$true] %s16_s10  ;;  %s221_s12 = int_to_ptr.vmem [resolvable:$true] %s25_s12 }
   0x4   :  { %s127_s15 = scalar_lea.hbm %s264_s0, 64 }
   0x5   :  { %p128_p0 = scmp.ne.s32.totalorder %s264_s0, %s127_s15  ;;  %p131_p1 = scmp.lt.u32.totalorder %s127_s15, %s264_s0 }
   0x7   :  { %p133_p2 = pnand %p131_p1, %p128_p0 }
   0x9   :  { %136 = shalt.err (!%p133_p2)
}
   0xa   :  { %s137_s20 = scalar_lea.vmem %s17_s10, 64  ;;  %p142_p4 = scmp.lt.s32.totalorder %s17_s10, %s17_s10 }
   0xb   :  { %p138_p3 = scmp.ne.s32.totalorder %s17_s10, %s137_s20  ;;  %p143_p5 = scmp.lt.s32.totalorder %s137_s20, %s137_s20 }
   0xd   :  { %p144_p6 = por %p143_p5, %p142_p4 }
   0xf   :  { %p145_p7 = pnand %p144_p6, %p138_p3 }
  0x11   :  { %148 = shalt.err (!%p145_p7)
}
  0x12   :  { %19 = dma.hbm_to_vmem [thread:$0]  %s264_s0, 64, %s17_s10, [#allocation3]  }
  0x13   :  { %s149_s25 = scalar_lea.hbm %s265_s1, 128 }
  0x14   :  { %p150_p8 = scmp.ne.s32.totalorder %s265_s1, %s149_s25  ;;  %p153_p9 = scmp.lt.u32.totalorder %s149_s25, %s265_s1 }
  0x16   :  { %p155_p10 = pnand %p153_p9, %p150_p8 }
  0x18   :  { %158 = shalt.err (!%p155_p10)
}
  0x19   :  { %s159_s30 = scalar_lea.vmem %s221_s12, 128  ;;  %p164_p12 = scmp.lt.s32.totalorder %s221_s12, %s221_s12 }
  0x1a   :  { %p160_p11 = scmp.ne.s32.totalorder %s221_s12, %s159_s30  ;;  %p165_p13 = scmp.lt.s32.totalorder %s159_s30, %s159_s30 }
  0x1c   :  { %p166_p0 = por %p165_p13, %p164_p12 }
  0x1e   :  { %p167_p1 = pnand %p166_p0, %p160_p11 }
  0x20   :  { %170 = shalt.err (!%p167_p1)
}
  0x21   :  { %s201_s0 = smov 64   ;;  %s202_s3 = smov 4  }
  0x22   :  { %31 = dma.hbm_to_vmem [thread:$0]  %s265_s1, 128, %s221_s12, [#allocation6], %s201_s0, %s201_s0, %s202_s3  }
  0x23   :  { %193 = dma.done.wait [#allocation3], 64  }
  0x24   :  { %194 = vsyncadd [#allocation3], 4294967232 }
  0x25   :  { %195 = dma.done.wait [#allocation6], 128  }
  0x26   :  { %196 = vsyncadd [#allocation6], 4294967168  ;;  %v203_v0 = vmov 0.0   ;;  %vm204_vm0 = vmmov 0   ;;  %v126_v1 = vld [vmem:[#allocation5] sm:$0xff]   ;;  %vm48_vm1 = vcmask 130048  }
  0x27   :  { %113 = vmatprep.subr.bf16.mxu0 %v203_v0  ;;  %115 = vmatprep.mubr.msk.bf16.mxu0 %vm204_vm0, %v203_v0  ;;  %v39_v2 = vld [vmem:[#allocation2] sm:$0xf]  ;;  %s205_s6 = smov [#allocation7]  }
  0x28   :  { %114 = vmatpush3.bf16.msra.mxu0 %v126_v1  ;;  %s99_s7 = sshll.u32 %s205_s6, 4  ;;  %s100_s7 = int_to_ptr.vmem [resolvable:$true] %s99_s7 }
  0x29   :  { %s171_s1 = scalar_lea.vmem %s100_s7, 128  ;;  %p176_p3 = scmp.lt.s32.totalorder %s100_s7, %s100_s7 }
  0x2a   :  { %p172_p2 = scmp.ne.s32.totalorder %s100_s7, %s171_s1  ;;  %p177_p4 = scmp.lt.s32.totalorder %s171_s1, %s171_s1 }
  0x2b   :  { %116 = vmatmul.mubr.msk.bf16.vlgmr.msra.gmra.mrb[0].mxu0 %vm48_vm1, %v39_v2 }
  0x2c   :  { %p178_p5 = por %p177_p4, %p176_p3 }
  0x2e   :  { %p179_p6 = pnand %p178_p5, %p172_p2 }
  0xfe   :  { %v86_v3 = vpop.f32.mrb[0].mxu0 }
  0xff   :  { %92 = vst [vmem:[#allocation7] sm:$0xff] %v86_v3  ;;  %v117_v4 = vpop.f32.mrb[1].mxu0 }
 0x100   :  { %v89_v5 = vpop.f32.mrb[2].mxu0 }
 0x101   :  { %182 = shalt.err (!%p179_p6)
}
 0x102   :  { %s183_s10 = scalar_lea.hbm %s266_s2, 128 }
 0x103   :  { %p184_p7 = scmp.ne.s32.totalorder %s266_s2, %s183_s10  ;;  %p187_p8 = scmp.lt.u32.totalorder %s183_s10, %s266_s2 }
 0x105   :  { %p189_p9 = pnand %p187_p8, %p184_p7 }
 0x107   :  { %192 = shalt.err (!%p189_p9)
}
 0x108   :  { %102 = dma.vmem_to_hbm [thread:$0]  %s100_s7, 128, %s266_s2, [#allocation4]   ;;  %v118_v6 = vpop.f32.mrb[3].mxu0 }
 0x109   :  { %197 = dma.done.wait [#allocation4], 128  }
 0x10a   :  { %198 = vsyncadd [#allocation4], 4294967168 }
 0x10b   :  { %106 = vsyncpa [#allocation3], 1 }
 0x10c   :  { %107 = vsyncpa [#allocation6], 1 }
 0x10d   :  { %108 = vsyncpa [#allocation4], 1 }

</bundles_post_ra>
